<compile_context>
chip_gen: v6e
topology: v6e:2x2x1
jax: 0.10.0
libtpu: 0.0.40
codegen_flags: <defaults>
</compile_context>

<pallas_src>
import jax
import jax.numpy as jnp
import numpy as np
from jax.experimental import pallas as pl
from jax.experimental.pallas import tpu as pltpu

# ---- small synthetic shapes consistent with the module -------------------
F = 2         # number of sparse features / embedding tables (kjt.keys())
B = 8         # batch size
D = 4         # embedding_dim (over_arch is Linear(4, 1) -> must be 4)
N = 32        # rows per embedding table
LMAX = 8      # max bag length (jagged lengths padded to this)
FN = F * N    # stacked folded-table length (64)
FN_PAD = 128  # lane-padded folded-table length (full 128-lane vreg width)


def ebc_linear_kernel(idx_ref, v_ref, bias_ref, out_ref):
    """Single gridless invocation handles all F features and the whole batch.

    idx_ref  : [F*B, LMAX] int32 VMEM -- per-bag indices, pre-offset by f*N
                                         into the stacked folded table;
                                         padded slots are -1 (never match).
    v_ref    : [1, FN_PAD] f32 VMEM   -- tables pre-contracted with the
                                         over_arch Linear weight, zero-padded
                                         to 128 lanes.
    bias_ref : [1, 1] f32 SMEM        -- over_arch Linear bias (scalar).
    out_ref  : [1, F*B] f32 VMEM      -- lane-dense output row.
    """
    idx = idx_ref[...]                                   # [FB, L] int32
    v = v_ref[...]                                       # [1, FNP] f32
    FB, L = idx.shape
    FNP = v.shape[1]

    # Row ids 0..127 as a single broadcast operand (no 3-D iota materialized).
    n_ids = jax.lax.broadcasted_iota(jnp.int32, (1, FNP), 1)   # [1, FNP]

    # Bag-count matrix M[r, n] = #occurrences of stacked row n in bag r.
    # Unrolled L=8 loop: one fused compare+select per slot, ~4 live vregs.
    # Sentinel -1 indices (padding) never match, so no mask multiply needed.
    M = jnp.zeros((FB, FNP), jnp.float32)
    for l in range(L):
        eq = idx[:, l:l + 1] == n_ids                    # [FB, FNP] bool
        M = M + jnp.where(eq, 1.0, 0.0)                  # cmp + select (VPU)

    # Folded Linear: VPU mul + XLU lane reduce (MXU deliberately not used).
    out = jnp.sum(M * v, axis=1)                         # [FB]
    out_ref[...] = (out[None, :] + bias_ref[0, 0]).astype(out_ref.dtype)


def fold_params(tables, w):
    """Fold over_arch Linear(D,1) weight into the tables (exact), once.

    v[f, n] = <tables[f, n, :], w[0, :]>, stacked over F and zero-padded to
    FN_PAD lanes.  Hoisted out of the per-call path.
    """
    v = jnp.einsum("fnd,d->fn",
                   tables.astype(jnp.float32), w[0].astype(jnp.float32))
    v_row = jnp.zeros((1, FN_PAD), jnp.float32).at[0, :FN].set(v.reshape(FN))
    return v_row


@jax.jit
def test_model_forward(idx, msk, v_row, bias):
    """idx:[F,B,LMAX] int32, msk:[F,B,LMAX] f32, v_row:[1,FN_PAD] f32 (folded
       tables), bias:[1] f32 -> [F*B, 1] f32."""
    # One wrapper pass: feature offset where valid, -1 sentinel where padded.
    # (Sentinel replaces the offset add for pads, so pads can never land at
    # an in-range stacked row.)
    feat_off = (jnp.arange(F, dtype=jnp.int32) * N)[:, None, None]
    idx_g = jnp.where(msk > 0, idx.astype(jnp.int32) + feat_off,
                      jnp.int32(-1)).reshape(F * B, LMAX)
    bias_2d = bias.reshape(1, 1).astype(jnp.float32)

    out_row = pl.pallas_call(
        ebc_linear_kernel,
        out_shape=jax.ShapeDtypeStruct((1, F * B), jnp.float32),
        in_specs=[
            pl.BlockSpec(memory_space=pltpu.MemorySpace.VMEM),   # idx (full)
            pl.BlockSpec(memory_space=pltpu.MemorySpace.VMEM),   # folded tables
            pl.BlockSpec(memory_space=pltpu.MemorySpace.SMEM),   # bias scalar
        ],
        out_specs=pl.BlockSpec(memory_space=pltpu.MemorySpace.VMEM),
    )(idx_g, v_row, bias_2d)

    # Lane-dense [1, F*B] kernel output -> [F*B, 1] column expected by caller.
    return out_row.reshape(F * B, 1)


def reference_forward(idx, msk, tables, w, bias):
    """Pure-JAX reference of TestModel.forward semantics."""
    outs = []
    for f in range(F):
        gathered = tables[f][idx[f]]                              # [B, LMAX, D]
        pooled = jnp.sum(gathered * msk[f][..., None], axis=1)    # sum-pool
        outs.append(pooled)
    sparse_features = jnp.concatenate(outs, axis=0)               # [F*B, D]
    return sparse_features @ w.T + bias                           # [F*B, 1]


if __name__ == "__main__":
    key = jax.random.PRNGKey(0)
    k_len, k_idx, k_tbl, k_w, k_b = jax.random.split(key, 5)

    # --- synthetic KeyedJaggedTensor: jagged lengths per (feature, batch) bag ---
    lengths = jax.random.randint(k_len, (F, B), 0, LMAX + 1)           # [F, B]
    idx = jax.random.randint(k_idx, (F, B, LMAX), 0, N).astype(jnp.int32)
    pos = jnp.arange(LMAX)[None, None, :]
    msk = (pos < lengths[..., None]).astype(jnp.float32)               # [F, B, LMAX]
    # NOTE: padded idx entries are left as arbitrary in-range values; the
    # kernel path neutralizes them with the -1 sentinel, the reference with msk.
    # TODO(synk): real data with bag lengths > LMAX or out-of-range ids would
    # need an assert; torch errors, this harness silently truncates/ignores.

    # --- deterministic parameters (EmbeddingBagCollection tables + Linear(4,1)) ---
    tables = jax.random.normal(k_tbl, (F, N, D), jnp.float32) * 0.1
    w = jax.random.normal(k_w, (1, D), jnp.float32) * 0.5              # torch Linear weight [out, in]
    bias = jax.random.normal(k_b, (1,), jnp.float32) * 0.1

    # Fold Linear weight into the tables once (not per call).
    v_row = fold_params(tables, w)

    out = test_model_forward(idx, msk, v_row, bias)
    out = jax.block_until_ready(out)

    ref = reference_forward(idx, msk, tables, w, bias)
    np.testing.assert_allclose(np.asarray(out), np.asarray(ref), rtol=1e-5, atol=1e-5)

    print("KERNEL_OK")
</pallas_src>

<mosaic_0001>
module attributes {stable_mosaic.version = 11 : i64} {
  func.func @ebc_linear_kernel(%arg0: memref<16x8xi32, #tpu.memory_space<vmem>>, %arg1: memref<1x128xf32, #tpu.memory_space<vmem>>, %arg2: memref<1x1xf32, #tpu.memory_space<smem>>, %arg3: memref<1x16xf32, #tpu.memory_space<vmem>>) attributes {dimension_semantics = [], scalar_prefetch = 0 : i64, scratch_operands = 0 : i64, tpu.core_type = #tpu.core_type<tc>} {
    %c0 = arith.constant 0 : index
    %c0_0 = arith.constant 0 : index
    %0 = vector.load %arg0[%c0, %c0_0] : memref<16x8xi32, #tpu.memory_space<vmem>>, vector<16x8xi32>
    %c0_1 = arith.constant 0 : index
    %c0_2 = arith.constant 0 : index
    %1 = vector.load %arg1[%c0_1, %c0_2] : memref<1x128xf32, #tpu.memory_space<vmem>>, vector<1x128xf32>
    %2 = tpu.iota {dimensions = array<i32: 1>} : vector<1x128xi32>
    %cst = arith.constant 0.000000e+00 : f32
    %3 = vector.broadcast %cst : f32 to vector<16x128xf32>
    %4 = vector.extract_strided_slice %0 {offsets = [0, 0], sizes = [16, 1], strides = [1, 1]} : vector<16x8xi32> to vector<16x1xi32>
    %5 = vector.broadcast %4 : vector<16x1xi32> to vector<16x128xi32>
    %6 = vector.broadcast %2 : vector<1x128xi32> to vector<16x128xi32>
    %7 = arith.cmpi eq, %5, %6 : vector<16x128xi32>
    %cst_3 = arith.constant 1.000000e+00 : f32
    %cst_4 = arith.constant 0.000000e+00 : f32
    %8 = vector.broadcast %cst_3 : f32 to vector<16x128xf32>
    %9 = vector.broadcast %cst_4 : f32 to vector<16x128xf32>
    %10 = arith.select %7, %8, %9 : vector<16x128xi1>, vector<16x128xf32>
    %11 = arith.addf %3, %10 : vector<16x128xf32>
    %12 = vector.extract_strided_slice %0 {offsets = [0, 1], sizes = [16, 1], strides = [1, 1]} : vector<16x8xi32> to vector<16x1xi32>
    %13 = vector.broadcast %12 : vector<16x1xi32> to vector<16x128xi32>
    %14 = vector.broadcast %2 : vector<1x128xi32> to vector<16x128xi32>
    %15 = arith.cmpi eq, %13, %14 : vector<16x128xi32>
    %cst_5 = arith.constant 1.000000e+00 : f32
    %cst_6 = arith.constant 0.000000e+00 : f32
    %16 = vector.broadcast %cst_5 : f32 to vector<16x128xf32>
    %17 = vector.broadcast %cst_6 : f32 to vector<16x128xf32>
    %18 = arith.select %15, %16, %17 : vector<16x128xi1>, vector<16x128xf32>
    %19 = arith.addf %11, %18 : vector<16x128xf32>
    %20 = vector.extract_strided_slice %0 {offsets = [0, 2], sizes = [16, 1], strides = [1, 1]} : vector<16x8xi32> to vector<16x1xi32>
    %21 = vector.broadcast %20 : vector<16x1xi32> to vector<16x128xi32>
    %22 = vector.broadcast %2 : vector<1x128xi32> to vector<16x128xi32>
    %23 = arith.cmpi eq, %21, %22 : vector<16x128xi32>
    %cst_7 = arith.constant 1.000000e+00 : f32
    %cst_8 = arith.constant 0.000000e+00 : f32
    %24 = vector.broadcast %cst_7 : f32 to vector<16x128xf32>
    %25 = vector.broadcast %cst_8 : f32 to vector<16x128xf32>
    %26 = arith.select %23, %24, %25 : vector<16x128xi1>, vector<16x128xf32>
    %27 = arith.addf %19, %26 : vector<16x128xf32>
    %28 = vector.extract_strided_slice %0 {offsets = [0, 3], sizes = [16, 1], strides = [1, 1]} : vector<16x8xi32> to vector<16x1xi32>
    %29 = vector.broadcast %28 : vector<16x1xi32> to vector<16x128xi32>
    %30 = vector.broadcast %2 : vector<1x128xi32> to vector<16x128xi32>
    %31 = arith.cmpi eq, %29, %30 : vector<16x128xi32>
    %cst_9 = arith.constant 1.000000e+00 : f32
    %cst_10 = arith.constant 0.000000e+00 : f32
    %32 = vector.broadcast %cst_9 : f32 to vector<16x128xf32>
    %33 = vector.broadcast %cst_10 : f32 to vector<16x128xf32>
    %34 = arith.select %31, %32, %33 : vector<16x128xi1>, vector<16x128xf32>
    %35 = arith.addf %27, %34 : vector<16x128xf32>
    %36 = vector.extract_strided_slice %0 {offsets = [0, 4], sizes = [16, 1], strides = [1, 1]} : vector<16x8xi32> to vector<16x1xi32>
    %37 = vector.broadcast %36 : vector<16x1xi32> to vector<16x128xi32>
    %38 = vector.broadcast %2 : vector<1x128xi32> to vector<16x128xi32>
    %39 = arith.cmpi eq, %37, %38 : vector<16x128xi32>
    %cst_11 = arith.constant 1.000000e+00 : f32
    %cst_12 = arith.constant 0.000000e+00 : f32
    %40 = vector.broadcast %cst_11 : f32 to vector<16x128xf32>
    %41 = vector.broadcast %cst_12 : f32 to vector<16x128xf32>
    %42 = arith.select %39, %40, %41 : vector<16x128xi1>, vector<16x128xf32>
    %43 = arith.addf %35, %42 : vector<16x128xf32>
    %44 = vector.extract_strided_slice %0 {offsets = [0, 5], sizes = [16, 1], strides = [1, 1]} : vector<16x8xi32> to vector<16x1xi32>
    %45 = vector.broadcast %44 : vector<16x1xi32> to vector<16x128xi32>
    %46 = vector.broadcast %2 : vector<1x128xi32> to vector<16x128xi32>
    %47 = arith.cmpi eq, %45, %46 : vector<16x128xi32>
    %cst_13 = arith.constant 1.000000e+00 : f32
    %cst_14 = arith.constant 0.000000e+00 : f32
    %48 = vector.broadcast %cst_13 : f32 to vector<16x128xf32>
    %49 = vector.broadcast %cst_14 : f32 to vector<16x128xf32>
    %50 = arith.select %47, %48, %49 : vector<16x128xi1>, vector<16x128xf32>
    %51 = arith.addf %43, %50 : vector<16x128xf32>
    %52 = vector.extract_strided_slice %0 {offsets = [0, 6], sizes = [16, 1], strides = [1, 1]} : vector<16x8xi32> to vector<16x1xi32>
    %53 = vector.broadcast %52 : vector<16x1xi32> to vector<16x128xi32>
    %54 = vector.broadcast %2 : vector<1x128xi32> to vector<16x128xi32>
    %55 = arith.cmpi eq, %53, %54 : vector<16x128xi32>
    %cst_15 = arith.constant 1.000000e+00 : f32
    %cst_16 = arith.constant 0.000000e+00 : f32
    %56 = vector.broadcast %cst_15 : f32 to vector<16x128xf32>
    %57 = vector.broadcast %cst_16 : f32 to vector<16x128xf32>
    %58 = arith.select %55, %56, %57 : vector<16x128xi1>, vector<16x128xf32>
    %59 = arith.addf %51, %58 : vector<16x128xf32>
    %60 = vector.extract_strided_slice %0 {offsets = [0, 7], sizes = [16, 1], strides = [1, 1]} : vector<16x8xi32> to vector<16x1xi32>
    %61 = vector.broadcast %60 : vector<16x1xi32> to vector<16x128xi32>
    %62 = vector.broadcast %2 : vector<1x128xi32> to vector<16x128xi32>
    %63 = arith.cmpi eq, %61, %62 : vector<16x128xi32>
    %cst_17 = arith.constant 1.000000e+00 : f32
    %cst_18 = arith.constant 0.000000e+00 : f32
    %64 = vector.broadcast %cst_17 : f32 to vector<16x128xf32>
    %65 = vector.broadcast %cst_18 : f32 to vector<16x128xf32>
    %66 = arith.select %63, %64, %65 : vector<16x128xi1>, vector<16x128xf32>
    %67 = arith.addf %59, %66 : vector<16x128xf32>
    %68 = vector.broadcast %1 : vector<1x128xf32> to vector<16x128xf32>
    %69 = arith.mulf %67, %68 : vector<16x128xf32>
    %cst_19 = arith.constant dense<0.000000e+00> : vector<16xf32>
    %70 = vector.multi_reduction <add>, %69, %cst_19 [1] : vector<16x128xf32> to vector<16xf32>
    %71 = vector.shape_cast %70 : vector<16xf32> to vector<1x16xf32>
    %c0_20 = arith.constant 0 : index
    %c0_21 = arith.constant 0 : index
    %72 = memref.load %arg2[%c0_20, %c0_21] : memref<1x1xf32, #tpu.memory_space<smem>>
    %73 = vector.broadcast %72 : f32 to vector<1x16xf32>
    %74 = arith.addf %71, %73 : vector<1x16xf32>
    %c0_22 = arith.constant 0 : index
    %c0_23 = arith.constant 0 : index
    %75 = vector.load %arg3[%c0_22, %c0_23] : memref<1x16xf32, #tpu.memory_space<vmem>>, vector<1x16xf32>
    tpu.vector_store %arg3[%c0_22, %c0_23], %74 {strides = array<i32>} : memref<1x16xf32, #tpu.memory_space<vmem>>, vector<1x16xf32>,
    return
  }
}

</mosaic_0001>

<bundles_post_ra>
// kernel: test_model_forward.1
= control target key start
LH: loop header
LB: loop body
LE: loop exit
PB: predicated region body
PF: predicated region fallthrough
CT: control target
= control target key end

     0   :  { %v209_v1 = vmov 1   ;;  %v210_v2 = vmov 0   ;;  %s276_s0 = inlined_call_operand.vmem [shape: s32[16,8], index: 0, kind: input, shape index: {}]   ;;  %s277_s1 = inlined_call_operand.vmem [shape: f32[1,128], index: 1, kind: input, shape index: {}]   ;;  %s278_s2 = inlined_call_operand.<no memory space> [shape: f32[1,1], index: 2, kind: input, shape index: {}]   ;;  %s279_s3 = inlined_call_operand.hbm [shape: f32[1,16], index: 3, kind: output, shape index: {}]  }
   0x1   :  { %v16_v0 = vld [vmem:[%s276_s0] sm:$0xff]  ;;  %175 = vset.pattern.permute.xlu1 %v209_v1  ;;  %174 = vset.pattern.permute.xlu0 %v210_v2 }
   0x2   :  { %9 = vsyncpa [#allocation4], 0  ;;  %34 = vperm.xlu1 %175, %v16_v0   ;;  %22 = vperm.xlu0 %174, %v16_v0   ;;  %v17_v3 = vld [vmem:[%s276_s0 + $0x8] sm:$0xff]  ;;  %v211_v4 = vmov 2   ;;  %v212_v5 = vmov 3   ;;  %v213_v6 = vmov 4   ;;  %v19_v15 = vlaneseq }
   0x3   :  { %v214_v7 = vmov 5   ;;  %v215_v8 = vmov 6   ;;  %v216_v9 = vmov 7   ;;  %v217_v21 = vmov 0.0   ;;  %v163_v54 = vld [vmem:[%s277_s1] ss:$0 sm:$0xff] }
   0x4   :  { %v246_v17 = vand.u32 127, %v19_v15  ;;  %v136_v62 = vshrl.u32 %v19_v15, 7  ;;  %s218_s1 = smov [#allocation3]  }
   0x5   :  { %s155_s19 = sshll.u32 %s218_s1, 4  ;;  %s156_s19 = int_to_ptr.vmem [resolvable:$true] %s155_s19 }
   0x6   :  { %37 = vperm.xlu1 %175, %v17_v3   ;;  %25 = vperm.xlu0 %174, %v17_v3   ;;  %v139_v63 = vadd.s32 4294967288, %v246_v17  ;;  %v137_v2 = vsub.s32 %v246_v17, %v136_v62  ;;  %s187_s20 = scalar_lea.vmem %s156_s19, 16  ;;  %s191_s21 = scalar_lea.vmem %s156_s19, 32 }
   0x7   :  { %p188_p0 = scmp.ne.s32.totalorder %s156_s19, %s187_s20  ;;  %p192_p1 = scmp.lt.s32.totalorder %s156_s19, %s156_s19 }
   0x8   :  { %p193_p2 = scmp.lt.s32.totalorder %s191_s21, %s187_s20 }
   0xa   :  { %177 = vset.pattern.permute.xlu1 %v211_v4  ;;  %176 = vset.pattern.permute.xlu0 %v211_v4  ;;  %v142_v4 = vsub.s32 %v139_v63, %v136_v62  ;;  %p194_p3 = por %p193_p2, %p192_p1 }
   0xb   :  { %49 = vperm.xlu1 %177, %v17_v3   ;;  %46 = vperm.xlu0 %176, %v16_v0  }
   0xc   :  { %p195_p4 = pnand %p194_p3, %p188_p0 }
   0xf   :  { %178 = vset.pattern.permute.xlu1 %v212_v5  ;;  %179 = vset.pattern.permute.xlu0 %v212_v5 }
  0x10   :  { %58 = vperm.xlu1 %178, %v16_v0   ;;  %61 = vperm.xlu0 %179, %v17_v3  }
  0x14   :  { %180 = vset.pattern.permute.xlu1 %v213_v6  ;;  %181 = vset.pattern.permute.xlu0 %v214_v7 }
  0x15   :  { %70 = vperm.xlu1 %180, %v16_v0   ;;  %82 = vperm.xlu0 %181, %v16_v0  }
  0x19   :  { %73 = vperm.xlu1 %180, %v17_v3   ;;  %184 = vset.pattern.permute.xlu0 %v215_v8 }
  0x1a   :  { %97 = vperm.xlu0 %184, %v17_v3  }
  0x1d   :  { %182 = vset.pattern.permute.xlu1 %v214_v7 }
  0x1e   :  { %85 = vperm.xlu1 %182, %v17_v3   ;;  %186 = vset.pattern.permute.xlu0 %v216_v9 }
  0x22   :  { %183 = vset.pattern.permute.xlu1 %v215_v8 }
  0x23   :  { %94 = vperm.xlu1 %183, %v16_v0  }
  0x27   :  { %185 = vset.pattern.permute.xlu1 %v216_v9 }
  0x28   :  { %106 = vperm.xlu1 %185, %v16_v0   ;;  %v130_v0 = vstv %s278_s2 }
  0x2c   :  { %109 = vperm.xlu1 %185, %v17_v3  }
  0x7d   :  { %v35_v10 = vpop.permute.xlu1 %34  ;;  %v23_v12 = vpop.permute.xlu0 %22 }
  0x7e   :  { %vm39_vm0 = vcmp.eq.s32.totalorder %v35_v10, %v246_v17  ;;  %vm27_vm1 = vcmp.eq.s32.totalorder %v23_v12, %v246_v17 }
  0x7f   :  { %v41_v22 = vsel %vm39_vm0, 1.0, %v217_v21  ;;  %v29_v23 = vsel %vm27_vm1, 1.0, %v217_v21  ;;  %vm144_vm0 = vcmask 130112   ;;  %vm147_vm1 = vcmask 122880  }
  0x80   :  { %v43_v26 = vadd.f32 %v41_v22, %v29_v23 }
  0x81   :  { %v38_v11 = vpop.permute.xlu1 %37  ;;  %v26_v14 = vpop.permute.xlu0 %25 }
  0x82   :  { %vm40_vm3 = vcmp.eq.s32.totalorder %v38_v11, %v246_v17  ;;  %vm28_vm4 = vcmp.eq.s32.totalorder %v26_v14, %v246_v17 }
  0x83   :  { %v42_v27 = vsel %vm40_vm3, 1.0, %v217_v21  ;;  %v30_v28 = vsel %vm28_vm4, 1.0, %v217_v21 }
  0x84   :  { %v44_v35 = vadd.f32 %v42_v27, %v30_v28 }
  0x86   :  { %v50_v13 = vpop.permute.xlu1 %49  ;;  %v47_v18 = vpop.permute.xlu0 %46 }
  0x87   :  { %vm51_vm2 = vcmp.eq.s32.totalorder %v47_v18, %v246_v17  ;;  %vm52_vm6 = vcmp.eq.s32.totalorder %v50_v13, %v246_v17 }
  0x88   :  { %v53_v25 = vsel %vm51_vm2, 1.0, %v217_v21  ;;  %v54_v33 = vsel %vm52_vm6, 1.0, %v217_v21 }
  0x89   :  { %v55_v32 = vadd.f32 %v53_v25, %v43_v26  ;;  %v56_v38 = vadd.f32 %v54_v33, %v44_v35 }
  0x8b   :  { %v59_v16 = vpop.permute.xlu1 %58  ;;  %v62_v24 = vpop.permute.xlu0 %61 }
  0x8c   :  { %vm63_vm5 = vcmp.eq.s32.totalorder %v59_v16, %v246_v17  ;;  %vm64_vm8 = vcmp.eq.s32.totalorder %v62_v24, %v246_v17 }
  0x8d   :  { %v65_v29 = vsel %vm63_vm5, 1.0, %v217_v21  ;;  %v66_v37 = vsel %vm64_vm8, 1.0, %v217_v21 }
  0x8e   :  { %v67_v36 = vadd.f32 %v65_v29, %v55_v32  ;;  %v68_v44 = vadd.f32 %v66_v37, %v56_v38 }
  0x90   :  { %v71_v19 = vpop.permute.xlu1 %70  ;;  %v83_v30 = vpop.permute.xlu0 %82 }
  0x91   :  { %vm75_vm7 = vcmp.eq.s32.totalorder %v71_v19, %v246_v17  ;;  %vm87_vm9 = vcmp.eq.s32.totalorder %v83_v30, %v246_v17 }
  0x92   :  { %v77_v34 = vsel %vm75_vm7, 1.0, %v217_v21  ;;  %v89_v41 = vsel %vm87_vm9, 1.0, %v217_v21 }
  0x93   :  { %v79_v39 = vadd.f32 %v77_v34, %v67_v36 }
  0x94   :  { %v74_v20 = vpop.permute.xlu1 %73 }
  0x95   :  { %vm76_vm10 = vcmp.eq.s32.totalorder %v74_v20, %v246_v17  ;;  %v98_v43 = vpop.permute.xlu0 %97  ;;  %v91_v47 = vadd.f32 %v89_v41, %v79_v39 }
  0x96   :  { %v78_v42 = vsel %vm76_vm10, 1.0, %v217_v21  ;;  %vm100_vm13 = vcmp.eq.s32.totalorder %v98_v43, %v246_v17 }
  0x97   :  { %v80_v48 = vadd.f32 %v78_v42, %v68_v44  ;;  %v102_v52 = vsel %vm100_vm13, 1.0, %v217_v21 }
  0x99   :  { %v86_v31 = vpop.permute.xlu1 %85 }
  0x9a   :  { %vm88_vm11 = vcmp.eq.s32.totalorder %v86_v31, %v246_v17 }
  0x9b   :  { %v90_v45 = vsel %vm88_vm11, 1.0, %v217_v21 }
  0x9c   :  { %v92_v50 = vadd.f32 %v90_v45, %v80_v48 }
  0x9e   :  { %v95_v40 = vpop.permute.xlu1 %94  ;;  %v104_v57 = vadd.f32 %v102_v52, %v92_v50 }
  0x9f   :  { %vm99_vm12 = vcmp.eq.s32.totalorder %v95_v40, %v246_v17 }
  0xa0   :  { %v101_v46 = vsel %vm99_vm12, 1.0, %v217_v21 }
  0xa1   :  { %v103_v51 = vadd.f32 %v101_v46, %v91_v47 }
  0xa3   :  { %v107_v49 = vpop.permute.xlu1 %106 }
  0xa4   :  { %vm111_vm14 = vcmp.eq.s32.totalorder %v107_v49, %v246_v17 }
  0xa5   :  { %v113_v53 = vsel %vm111_vm14, 1.0, %v217_v21 }
  0xa6   :  { %v115_v55 = vadd.f32 %v113_v53, %v103_v51 }
  0xa7   :  { %v110_v56 = vpop.permute.xlu1 %109 }
  0xa8   :  { %vm112_vm15 = vcmp.eq.s32.totalorder %v110_v56, %v246_v17  ;;  %v123_v58 = vmul.f32 %v163_v54, %v115_v55 }
  0xa9   :  { %v114_v59 = vsel %vm112_vm15, 1.0, %v217_v21 }
  0xaa   :  { %v116_v60 = vadd.f32 %v114_v59, %v104_v57  ;;  %125 = vadd.xlane.f32.xlu0 %v123_v58 }
  0xac   :  { %v124_v61 = vmul.f32 %v163_v54, %v116_v60 }
  0xae   :  { %127 = vadd.xlane.f32.xlu1 %v124_v61 }
 0x133   :  { %v126_v1 = vpop.xlane.xlu0 %125 }
 0x134   :  { %v131_v3 = vadd.f32 %v130_v0, %v126_v1 }
 0x136   :  { %v138_v7 = vrot.slane %v131_v3, %v137_v2 }
 0x137   :  { %v128_v5 = vpop.xlane.xlu1 %127 }
 0x138   :  { %v132_v6 = vadd.f32 %v130_v0, %v128_v5 }
 0x13a   :  { %v143_v8 = vrot.slane %v132_v6, %v142_v4 }
 0x13c   :  { %v145_v9 = vsel %vm144_vm0, %v143_v8, %v138_v7 }
 0x13d   :  { %148 = vst.msk [vmem:[#allocation3] sm:$0x1] %vm147_vm1, %v145_v9 }
 0x13e   :  { %198 = shalt.err (!%p195_p4)
}
 0x13f   :  { %158 = dma.vmem_to_hbm [thread:$0]  %s156_s19, 16, %s279_s3, [#allocation4]  }
 0x140   :  { %207 = dma.done.wait [#allocation4], 16  }
 0x141   :  { %208 = vsyncadd [#allocation4], 4294967280 }
 0x142   :  { %162 = vsyncpa [#allocation4], 1 }

</bundles_post_ra>
